<compile_context>
chip_gen: v6e
topology: v6e:2x2x1
jax: 0.10.0
libtpu: 0.0.40
codegen_flags: <defaults>
</compile_context>

<pallas_src>
import numpy as np
import jax
import jax.numpy as jnp
from jax import lax
from jax.experimental import pallas as pl
from jax.experimental.pallas import tpu as pltpu

# Keep XLA's f32 matmuls (reference path + wrapper prep) in true f32 so the
# comparison against the in-kernel full-precision matmul is tight.
jax.config.update("jax_default_matmul_precision", "highest")

_LANES = 128  # vreg lane width


def _make_mhsa_kernel(D, S, Dp, SP):
    """Return the single-step kernel specialized to the static sizes."""

    def kernel(slab_ref, out_ref):
        # slab_ref: (Dp + 8, SP) f32 packed slab (layout in module docstring).
        # out_ref : (8, SP) f32 lane-dense output; row 0 holds the (1, D) result.
        xk = slab_ref[0:Dp, :]                   # (Dp, SP) x.T + ones, seq on lanes
        wblk = slab_ref[Dp:Dp + 8, 0:Dp]         # (8, Dp) rows 0/1 = folded K / V
        # One MXU pass: row 0 -> scores (= qs*scale*k_s), row 1 -> values v_s.
        kv = jnp.dot(wblk, xk, preferred_element_type=jnp.float32)   # (8, SP)
        scores = kv[0:1, :]                      # (1, SP)
        v = kv[1:2, :]                           # (1, SP)

        # Mask the zero-padded lanes (>= S) out of the softmax.
        lane = lax.broadcasted_iota(jnp.int32, (1, SP), 1)
        scores = jnp.where(lane < S, scores, jnp.float32(-1e30))

        m = jnp.max(scores, axis=-1, keepdims=True)      # lane-wide reduce
        p = jnp.exp(scores - m)                          # EUP; padded lanes -> 0
        num = jnp.sum(p * v, axis=-1, keepdims=True)     # (1, 1)
        den = jnp.sum(p, axis=-1, keepdims=True)         # (1, 1)
        head = num * pl.reciprocal(den, approx=True)     # EUP approx reciprocal

        # LinO collapsed algebraically: concat broadcasts the single head
        # scalar, so out = head * rowsum(Wo) + bo (padded lanes stay 0).
        out_row = (head * slab_ref[Dp + 2:Dp + 3, :]
                   + slab_ref[Dp + 3:Dp + 4, :])         # (1, SP)
        out_ref[...] = jnp.broadcast_to(out_row, (8, SP))  # full-vreg store

    return kernel


def multihead_self_attention(inputs, params, *, num_head):
    """inputs: (S, B, d_model) with B == 1 and d_model // num_head == 1."""
    wq, bq, wk, bk, wv, bv, wo, bo = params
    S, B, d_model = inputs.shape
    d_k = d_model // num_head
    if B != 1 or d_k != 1:
        raise ValueError(
            "reference module only executes for B==1 and d_model//num_head==1")
    if S > _LANES:
        raise NotImplementedError(
            "single-tile kernel supports S <= 128; larger S needs the re-tiled "
            "online-softmax variant described in the module docstring")

    D = d_model
    f32 = jnp.float32
    x = inputs[:, 0, :].astype(f32)                      # (S, D)
    wq, bq = wq.astype(f32), bq.astype(f32)
    wk, bk = wk.astype(f32), bk.astype(f32)
    wv, bv = wv.astype(f32), bv.astype(f32)
    wo, bo = wo.astype(f32), bo.astype(f32)

    # q is a single scalar; fold qs*scale into the Wk row so the kernel's score
    # row comes straight out of the stacked matmul.
    scale = 1.0 / np.sqrt(float(d_k))                    # == 1.0 here
    qs = (jnp.dot(x[0], wq[0]) + bq[0]) * scale          # scalar

    SP = _LANES
    Dp = ((D + 1 + 7) // 8) * 8                          # contraction rows (24)

    def z(*shape):
        return jnp.zeros(shape, f32)

    # Single packed slab, built with pure concatenation (fuses into one buffer).
    x_rows = jnp.concatenate([x.T, z(D, SP - S)], axis=1)                  # (D, SP)
    ones_row = jnp.concatenate([jnp.ones((1, S), f32), z(1, SP - S)], axis=1)
    pad_rows = z(Dp - D - 1, SP)
    k_row = jnp.concatenate([qs * wk[0], qs * bk, z(SP - D - 1)])[None, :]
    v_row = jnp.concatenate([wv[0], bv, z(SP - D - 1)])[None, :]
    o_row = jnp.concatenate([jnp.sum(wo, axis=1), z(SP - D)])[None, :]
    b_row = jnp.concatenate([bo, z(SP - D)])[None, :]
    tail = z(4, SP)                                       # full 8-row weight tile
    slab = jnp.concatenate(
        [x_rows, ones_row, pad_rows, k_row, v_row, o_row, b_row, tail], axis=0)
    # slab: (Dp + 8, SP) == (32, 128) f32 -> one input DMA.

    out = pl.pallas_call(
        _make_mhsa_kernel(D, S, Dp, SP),
        out_shape=jax.ShapeDtypeStruct((8, SP), f32),
        in_specs=[pl.BlockSpec(memory_space=pltpu.MemorySpace.VMEM)],
        out_specs=pl.BlockSpec(memory_space=pltpu.MemorySpace.VMEM),
    )(slab)
    return out[0:1, :D]


def _reference_forward(inputs, params, num_head):
    """Literal JAX transcription of the PyTorch forward (eval-mode dropout)."""
    wq, bq, wk, bk, wv, bv, wo, bo = params
    x = inputs.astype(jnp.float32)

    def one_head():
        Q = x @ wq.T + bq                      # (S, B, d_k)
        K = x @ wk.T + bk
        V = x @ wv.T + bv
        Kt = jnp.swapaxes(K, 0, 1)             # (B, S, d_k)
        Vt = jnp.swapaxes(V, 0, 1)
        outs = []
        for i in range(min(Q.shape[0], Kt.shape[0])):   # runs once when B == 1
            q = Q[i].reshape(1, Q[i].shape[0])
            k, v = Kt[i], Vt[i]
            kT = jnp.swapaxes(k, -2, -1)
            w = jax.nn.softmax((q @ kT) / np.sqrt(kT.shape[-2]), axis=1)
            outs.append(w @ v)
        return jnp.concatenate(outs, axis=0).reshape(Vt.shape[0], Vt.shape[2])

    heads = [one_head() for _ in range(num_head)]        # heads share weights
    concat = jnp.concatenate(heads, axis=-1)
    return concat @ wo.T + bo


if __name__ == "__main__":
    S, B, d_model = 64, 1, 16
    num_head = d_model           # required: d_model // num_head == 1
    dropout = 0.5                # eval-mode dropout == identity (see TODO above)

    key = jax.random.PRNGKey(0)
    k_in, kq, kqb, kk, kkb, kvw, kvb, ko, kob = jax.random.split(key, 9)
    d_k = d_model // num_head

    def lin_init(kw, kb, out_f, in_f):
        bound = 1.0 / np.sqrt(in_f)
        w = jax.random.uniform(kw, (out_f, in_f), jnp.float32, -bound, bound)
        b = jax.random.uniform(kb, (out_f,), jnp.float32, -bound, bound)
        return w, b

    wq, bq = lin_init(kq, kqb, d_k, d_model)     # LinQ: d_model -> d_model//num_head
    wk, bk = lin_init(kk, kkb, d_k, d_model)     # LinK
    wv, bv = lin_init(kvw, kvb, d_k, d_model)    # LinV
    wo, bo = lin_init(ko, kob, d_model, d_model) # LinO
    params = (wq, bq, wk, bk, wv, bv, wo, bo)

    inputs = jax.random.normal(k_in, (S, B, d_model), jnp.float32)

    fwd = jax.jit(lambda inp, prm: multihead_self_attention(inp, prm, num_head=num_head))
    out = jax.block_until_ready(fwd(inputs, params))

    ref = _reference_forward(inputs, params, num_head)
    # Tolerance leaves headroom for the EUP approximate reciprocal used for the
    # softmax normalization (pl.reciprocal(approx=True)); real bugs would show
    # as O(1e-1) errors.
    np.testing.assert_allclose(np.asarray(out), np.asarray(ref),
                               rtol=2e-3, atol=5e-4)
    print("KERNEL_OK")
</pallas_src>

<mosaic_0001>
module attributes {stable_mosaic.version = 11 : i64} {
  func.func @kernel(%arg0: memref<32x128xf32, #tpu.memory_space<vmem>>, %arg1: memref<8x128xf32, #tpu.memory_space<vmem>>) attributes {dimension_semantics = [], scalar_prefetch = 0 : i64, scratch_operands = 0 : i64, tpu.core_type = #tpu.core_type<tc>} {
    %c0 = arith.constant 0 : index
    %c0_0 = arith.constant 0 : index
    %0 = vector.load %arg0[%c0, %c0_0] : memref<32x128xf32, #tpu.memory_space<vmem>>, vector<24x128xf32>
    %c24 = arith.constant 24 : index
    %c0_1 = arith.constant 0 : index
    %1 = vector.load %arg0[%c24, %c0_1] : memref<32x128xf32, #tpu.memory_space<vmem>>, vector<8x24xf32>
    %cst = arith.constant dense<0.000000e+00> : vector<8x128xf32>
    %2 = tpu.matmul %1, %0, %cst {dimension_numbers = #tpu.dot_dimension_numbers<[1], [0], [0], [1], [0, 0, 1, 1], [], []>, precision = #tpu.contract_precision<fp32>} : vector<8x24xf32>, vector<24x128xf32>, vector<8x128xf32> -> vector<8x128xf32>
    %3 = vector.extract_strided_slice %2 {offsets = [0, 0], sizes = [1, 128], strides = [1, 1]} : vector<8x128xf32> to vector<1x128xf32>
    %4 = vector.extract_strided_slice %2 {offsets = [1, 0], sizes = [1, 128], strides = [1, 1]} : vector<8x128xf32> to vector<1x128xf32>
    %5 = tpu.iota {dimensions = array<i32: 1>} : vector<1x128xi32>
    %c64_i32 = arith.constant 64 : i32
    %6 = vector.broadcast %c64_i32 : i32 to vector<1x128xi32>
    %7 = arith.cmpi slt, %5, %6 : vector<1x128xi32>
    %cst_2 = arith.constant -1.000000e+30 : f32
    %8 = vector.broadcast %cst_2 : f32 to vector<1x128xf32>
    %9 = arith.select %7, %3, %8 : vector<1x128xi1>, vector<1x128xf32>
    %cst_3 = arith.constant dense<0xFF800000> : vector<1xf32>
    %10 = vector.multi_reduction <maximumf>, %9, %cst_3 [1] : vector<1x128xf32> to vector<1xf32>
    %11 = vector.shape_cast %10 : vector<1xf32> to vector<1x1xf32>
    %12 = vector.broadcast %11 : vector<1x1xf32> to vector<1x128xf32>
    %13 = arith.subf %9, %12 : vector<1x128xf32>
    %14 = math.exp %13 : vector<1x128xf32>
    %15 = arith.mulf %14, %4 : vector<1x128xf32>
    %cst_4 = arith.constant dense<0.000000e+00> : vector<1xf32>
    %16 = vector.multi_reduction <add>, %15, %cst_4 [1] : vector<1x128xf32> to vector<1xf32>
    %17 = vector.shape_cast %16 : vector<1xf32> to vector<1x1xf32>
    %cst_5 = arith.constant dense<0.000000e+00> : vector<1xf32>
    %18 = vector.multi_reduction <add>, %14, %cst_5 [1] : vector<1x128xf32> to vector<1xf32>
    %19 = vector.shape_cast %18 : vector<1xf32> to vector<1x1xf32>
    %20 = tpu.reciprocal %19 {approx = true} : vector<1x1xf32> -> vector<1x1xf32>
    %21 = arith.mulf %17, %20 : vector<1x1xf32>
    %c26 = arith.constant 26 : index
    %c0_6 = arith.constant 0 : index
    %22 = vector.load %arg0[%c26, %c0_6] : memref<32x128xf32, #tpu.memory_space<vmem>>, vector<1x128xf32>
    %23 = vector.broadcast %21 : vector<1x1xf32> to vector<1x128xf32>
    %24 = arith.mulf %23, %22 : vector<1x128xf32>
    %c27 = arith.constant 27 : index
    %c0_7 = arith.constant 0 : index
    %25 = vector.load %arg0[%c27, %c0_7] : memref<32x128xf32, #tpu.memory_space<vmem>>, vector<1x128xf32>
    %26 = arith.addf %24, %25 : vector<1x128xf32>
    %27 = vector.shape_cast %26 : vector<1x128xf32> to vector<1x128xf32>
    %28 = vector.broadcast %27 : vector<1x128xf32> to vector<8x128xf32>
    %c0_8 = arith.constant 0 : index
    %c0_9 = arith.constant 0 : index
    %29 = vector.load %arg1[%c0_8, %c0_9] : memref<8x128xf32, #tpu.memory_space<vmem>>, vector<8x128xf32>
    tpu.vector_store %arg1[%c0_8, %c0_9], %28 {strides = array<i32>} : memref<8x128xf32, #tpu.memory_space<vmem>>, vector<8x128xf32>,
    return
  }
}

</mosaic_0001>

<bundles_post_ra>
// kernel: _lambda_.1
= control target key start
LH: loop header
LB: loop body
LE: loop exit
PB: predicated region body
PF: predicated region fallthrough
CT: control target
= control target key end

     0   :  { %vm12_vm0 = vcmask 195584   ;;  %v608_v0 = vmov 0.0   ;;  %vm609_vm1 = vmmov 0   ;;  %v488_v34 = vlaneseq  ;;  %s683_s0 = inlined_call_operand.vmem [shape: f32[32,128], index: 0, kind: input, shape index: {}]   ;;  %s684_s1 = inlined_call_operand.vmem [shape: f32[8,128], index: 1, kind: output, shape index: {}]  }
   0x1   :  { %548 = vmatprep.subr.mxu0 %v608_v0  ;;  %v10_v1 = vld [vmem:[%s683_s0 + $0x10] sm:$0xff]  ;;  %v9_v2 = vld [vmem:[%s683_s0 + $0x8] sm:$0xff]  ;;  %557 = vmatprep.subr.mxu1 %v608_v0  ;;  %v8_v3 = vld [vmem:[%s683_s0] sm:$0xff]  ;;  %vm492_vm3 = vcmask 1040384  }
   0x2   :  { %v43_v4 = vand.u32 4294901760, %v10_v1  ;;  %v631_v5 = vand.u32 4294901760, %v9_v2  ;;  %v633_v6 = vand.u32 4294901760, %v8_v3  ;;  %554 = vmatprep.mubr.msk.f32.mxu0 %vm609_vm1, %v608_v0  ;;  %v11_v7 = vld [vmem:[%s683_s0 + $0x18] sm:$0xff]  ;;  %563 = vmatprep.mubr.msk.f32.mxu1 %vm609_vm1, %v608_v0  ;;  %v489_v39 = vand.u32 127, %v488_v34 }
   0x3   :  { %v14_v8 = vsel %vm12_vm0, %v11_v7, 0  ;;  %v516_v56 = vshrl.u32 %v488_v34, 7  ;;  %v511_v58 = vld [vmem:[%s683_s0 + $0x1a] sm:$0x1]  ;;  %v513_v61 = vld [vmem:[%s683_s0 + $0x1b] sm:$0x1] }
   0x4   :  { %549 = vmatpush3.msra.mxu0 %v43_v4  ;;  %v122_v9 = vsub.f32 %v10_v1, %v43_v4  ;;  %v84_v10 = vand.u32 4294901760, %v14_v8  ;;  %v129_v11 = vsub.f32 %v9_v2, %v631_v5  ;;  %v136_v12 = vsub.f32 %v8_v3, %v633_v6 }
   0x5   :  { %550 = vmatprep.subr.mxu0 %v608_v0  ;;  %vm490_vm2 = vcmp.lt.s32.totalorder %v489_v39, 64  ;;  %v517_v62 = vsub.s32 0, %v516_v56 }
   0x6   :  { %551 = vmatpush3.msra.mxu0 %v631_v5  ;;  %v123_v13 = vand.u32 4294901760, %v122_v9  ;;  %v85_v14 = vsub.f32 %v14_v8, %v84_v10  ;;  %v130_v15 = vand.u32 4294901760, %v129_v11  ;;  %v137_v16 = vand.u32 4294901760, %v136_v12 }
   0x7   :  { %552 = vmatprep.subr.mxu0 %v608_v0 }
   0x8   :  { %553 = vmatpush3.msra.mxu0 %v633_v6  ;;  %v124_v17 = vsub.f32 %v122_v9, %v123_v13  ;;  %v86_v18 = vand.u32 4294901760, %v85_v14  ;;  %v131_v19 = vsub.f32 %v129_v11, %v130_v15  ;;  %v138_v20 = vsub.f32 %v136_v12, %v137_v16 }
   0x9   :  { %566 = vmatprep.subr.mxu0 %v608_v0 }
   0xa   :  { %v125_v21 = vand.u32 4294901760, %v124_v17  ;;  %v87_v22 = vsub.f32 %v85_v14, %v86_v18  ;;  %v132_v23 = vand.u32 4294901760, %v131_v19  ;;  %v139_v25 = vand.u32 4294901760, %v138_v20 }
   0xc   :  { %558 = vmatpush3.msra.mxu1 %v125_v21  ;;  %v88_v24 = vand.u32 4294901760, %v87_v22 }
   0xd   :  { %559 = vmatprep.subr.mxu1 %v608_v0 }
   0xe   :  { %555 = vmatmul.mubr.f32.vlgmr.msra.gmra.mxu0 %v88_v24  ;;  %560 = vmatpush3.msra.mxu1 %v132_v23 }
   0xf   :  { %567 = vmatpush3.msra.mxu0 %v122_v9  ;;  %561 = vmatprep.subr.mxu1 %v608_v0 }
  0x10   :  { %568 = vmatprep.subr.mxu0 %v608_v0  ;;  %562 = vmatpush3.msra.mxu1 %v139_v25 }
  0x11   :  { %569 = vmatpush3.msra.mxu0 %v129_v11  ;;  %564 = vmatmul.mubr.f32.vlgmr.msra.gmra.mxu1 %v84_v10 }
  0x12   :  { %570 = vmatprep.subr.mxu0 %v608_v0  ;;  %575 = vmatprep.subr.mxu1 %v608_v0 }
  0x13   :  { %571 = vmatpush3.msra.mxu0 %v136_v12  ;;  %572 = vmatprep.mubr.msk.f32.mxu0 %vm609_vm1, %v608_v0 }
  0x14   :  { %576 = vmatpush3.msra.mxu1 %v43_v4  ;;  %573 = vmatmul.mubr.f32.vlgmr.msra.gmra.mxu0 %v85_v14 }
  0x15   :  { %577 = vmatprep.subr.mxu1 %v608_v0  ;;  %584 = vmatprep.subr.mxu0 %v608_v0 }
  0x16   :  { %578 = vmatpush3.msra.mxu1 %v631_v5  ;;  %585 = vmatpush3.msra.mxu0 %v123_v13 }
  0x17   :  { %579 = vmatprep.subr.mxu1 %v608_v0  ;;  %586 = vmatprep.subr.mxu0 %v608_v0 }
  0x18   :  { %580 = vmatpush3.msra.mxu1 %v633_v6  ;;  %581 = vmatprep.mubr.msk.f32.mxu1 %vm609_vm1, %v608_v0 }
  0x19   :  { %587 = vmatpush3.msra.mxu0 %v130_v15  ;;  %582 = vmatmul.mubr.f32.vlgmr.msra.gmra.mxu1 %v86_v18 }
  0x1a   :  { %588 = vmatprep.subr.mxu0 %v608_v0  ;;  %593 = vmatprep.subr.mxu1 %v608_v0 }
  0x1b   :  { %589 = vmatpush3.msra.mxu0 %v137_v16  ;;  %590 = vmatprep.mubr.msk.f32.mxu0 %vm609_vm1, %v608_v0 }
  0x1c   :  { %594 = vmatpush3.msra.mxu1 %v43_v4  ;;  %591 = vmatmul.mubr.f32.vlgmr.msra.gmra.mxu0 %v84_v10 }
  0x1d   :  { %595 = vmatprep.subr.mxu1 %v608_v0  ;;  %599 = vmatprep.mubr.msk.f32.mxu1 %vm609_vm1, %v608_v0 }
  0x1e   :  { %596 = vmatpush3.msra.mxu1 %v631_v5 }
  0x1f   :  { %597 = vmatprep.subr.mxu1 %v608_v0 }
  0x20   :  { %598 = vmatpush3.msra.mxu1 %v633_v6 }
  0x21   :  { %600 = vmatmul.mubr.f32.vlgmr.msra.gmra.mxu1 %v84_v10 }
  0xce   :  { %v90_v26 = vpop.f32.mrf.mxu0 }
  0xd0   :  { %v556_v27 = vpop.f32.mrf.mxu0 }
  0xd1   :  { %v176_v28 = vpop.f32.mrf.mxu1 }
  0xd2   :  { %v177_v31 = vadd.f32 %v176_v28, %v90_v26 }
  0xd3   :  { %v565_v29 = vpop.f32.mrf.mxu1 }
  0xd4   :  { %v254_v30 = vpop.f32.mrf.mxu0 }
  0xd5   :  { %v255_v35 = vadd.f32 %v254_v30, %v177_v31 }
  0xd6   :  { %v574_v32 = vpop.f32.mrf.mxu0 }
  0xd9   :  { %v330_v33 = vpop.f32.mrf.mxu1 }
  0xda   :  { %v331_v37 = vadd.f32 %v330_v33, %v255_v35 }
  0xdb   :  { %v583_v36 = vpop.f32.mrf.mxu1 }
  0xdc   :  { %v410_v38 = vpop.f32.mrf.mxu0 }
  0xdd   :  { %v411_v41 = vadd.f32 %v410_v38, %v331_v37 }
  0xde   :  { %v592_v40 = vpop.f32.mrf.mxu0 }
  0xe1   :  { %v484_v42 = vpop.f32.mrf.mxu1 }
  0xe2   :  { %v485_v43 = vadd.f32 %v484_v42, %v411_v41 }
  0xe3   :  { %v601_v44 = vpop.f32.mrf.mxu1 }
  0xe4   :  { %v491_v45 = vsel %vm490_vm2, %v485_v43, -1e+30  ;;  %v500_v50 = vrot.slane %v485_v43, 1 }
  0xe5   :  { %v493_v46 = vsel %vm492_vm3, %v491_v45, -inf }
  0xe6   :  { %494 = vmax.xlane.f32.xlu0 %v493_v46 }
 0x16f   :  { %v495_v47 = vpop.xlane.xlu0 %494 }
 0x170   :  { %v496_v48 = vsub.f32 %v491_v45, %v495_v47 }
 0x172   :  { %v497_v49 = vmul.f32 1.442695, %v496_v48 }
 0x174   :  { %604 = vpow2.f32 %v497_v49 }
 0x181   :  { %v605_v51 = vpop.eup %604 }
 0x182   :  { %v506_v52 = vsel %vm492_vm3, %v605_v51, 0.0  ;;  %v502_v53 = vmul.f32 %v605_v51, %v500_v50 }
 0x183   :  { %507 = vadd.xlane.f32.xlu0 %v506_v52 }
 0x184   :  { %v503_v54 = vsel %vm492_vm3, %v502_v53, 0.0 }
 0x185   :  { %504 = vadd.xlane.f32.xlu1 %v503_v54 }
 0x20c   :  { %v508_v55 = vpop.xlane.xlu0 %507 }
 0x20d   :  { %606 = vrcp.f32 %v508_v55 }
 0x20e   :  { %v505_v59 = vpop.xlane.xlu1 %504 }
 0x21a   :  { %v607_v57 = vpop.eup %606 }
 0x21b   :  { %v510_v60 = vmul.f32 %v607_v57, %v505_v59 }
 0x21d   :  { %v512_v63 = vmul.f32 %v511_v58, %v510_v60 }
 0x21f   :  { %v514_v0 = vadd.f32 %v513_v61, %v512_v63 }
 0x221   :  { %v518_v1 = vrot.slane %v514_v0, %v517_v62 }
 0x223   :  { %519 = vst [vmem:[%s684_s1] sm:$0xff] %v518_v1 }

</bundles_post_ra>
